<compile_context>
chip_gen: v7x
topology: tpu7x:2x2x1
jax: 0.10.0
libtpu: 0.0.40
codegen_flags: <defaults>
</compile_context>

<pallas_src>
import jax
import jax.numpy as jnp
from jax import lax
from jax.experimental import pallas as pl
from jax.experimental.pallas import tpu as pltpu

_LANE = 128      # pad class dim to lane width for lane-dense output stores
_SUBLANE = 8     # batch tile granularity


def _round_up(n, m):
    return ((n + m - 1) // m) * m


def _sim_kernel(x_ref, emb_ref, out_ref):
    """One batch tile: normalize x rows (f32 math, EUP rsqrt), fold the 100x
    scale into the per-row factor, one MXU matmul contracting the feature dim
    of both operands (no RHS transpose)."""
    x = x_ref[...].astype(jnp.float32)                              # (TB, D)
    ss = jnp.sum(x * x, axis=-1, keepdims=True)                     # (TB, 1)
    scale = 100.0 * lax.rsqrt(jnp.maximum(ss, jnp.finfo(jnp.float32).tiny))
    x_n = (x * scale).astype(x_ref.dtype)                           # keep MXU dtype (bf16 stays bf16)
    sim = lax.dot_general(
        x_n, emb_ref[...],
        dimension_numbers=(((1,), (1,)), ((), ())),                 # contract feature dims
        preferred_element_type=jnp.float32)                         # (TB, Cp)
    out_ref[...] = sim.astype(out_ref.dtype)


def sim_classifier(x, embeddings, *, block_b=512):
    """x: (B, D) image features; embeddings: (C, D) class prompt embeddings.
    Returns squeeze(100 * normalize(x) @ normalize(embeddings).T)."""
    if x.ndim == 1:
        x = x[None, :]
    B, D = x.shape
    C, D2 = embeddings.shape
    assert D == D2, "feature dims must match"

    # --- normalize embeddings once (constant across the batch) -------------
    e32 = embeddings.astype(jnp.float32)
    e_ss = jnp.sum(e32 * e32, axis=-1, keepdims=True)
    e_norm = (e32 * lax.rsqrt(jnp.maximum(e_ss, jnp.finfo(jnp.float32).tiny))
              ).astype(embeddings.dtype)

    # --- pad class dim to lane width (zero rows are already "normalized") --
    Cp = _round_up(max(C, _LANE), _LANE)
    emb_p = jnp.pad(e_norm, ((0, Cp - C), (0, 0))) if Cp != C else e_norm

    # --- batch tiling: sublane-aligned, VMEM-safe on v5e/v6e/v7x ------------
    TB = min(block_b, _round_up(B, _SUBLANE))
    TB = _round_up(TB, _SUBLANE)
    Bp = _round_up(B, TB)
    x_p = jnp.pad(x, ((0, Bp - B), (0, 0))) if Bp != B else x
    grid = (Bp // TB,)

    itemsize = jnp.dtype(x.dtype).itemsize
    cost = pl.CostEstimate(
        flops=2 * Bp * Cp * D + 3 * Bp * D,
        transcendentals=Bp,                      # one rsqrt per row
        bytes_accessed=(Bp * D + Cp * D) * itemsize + Bp * Cp * 4,
    )

    sim = pl.pallas_call(
        _sim_kernel,
        out_shape=jax.ShapeDtypeStruct((Bp, Cp), jnp.float32),
        grid_spec=pltpu.PrefetchScalarGridSpec(
            num_scalar_prefetch=0,
            grid=grid,
            in_specs=[
                pl.BlockSpec((TB, D), lambda i: (i, 0)),   # batch tile of x
                pl.BlockSpec((Cp, D), lambda i: (0, 0)),   # embeddings stay resident
            ],
            out_specs=pl.BlockSpec((TB, Cp), lambda i: (i, 0)),
        ),
        compiler_params=pltpu.CompilerParams(
            dimension_semantics=("parallel",),             # shard batch across TCs (v7x)
        ),
        cost_estimate=cost,
    )(x_p, emb_p)

    sim = sim[:B, :C]
    # Matches torch's .squeeze() (drops all size-1 dims).
    return jnp.squeeze(sim)


if __name__ == "__main__":
    key = jax.random.PRNGKey(0)
    kx, ke, kx2, ke2 = jax.random.split(key, 4)

    def _ref(x, embeddings):
        x_n = x / jnp.linalg.norm(x, axis=-1, keepdims=True)
        e_n = embeddings / jnp.linalg.norm(embeddings, axis=-1, keepdims=True)
        return jnp.squeeze(100.0 * x_n @ e_n.T)

    # Q16-sized case: batch=8, feature=128, 2 classes.
    B, D, C = 8, 128, 2
    x = jax.random.normal(kx, (B, D), dtype=jnp.float32)
    embeddings = jax.random.normal(ke, (C, D), dtype=jnp.float32)
    out = jax.block_until_ready(sim_classifier(x, embeddings))
    ref = _ref(x, embeddings)
    assert out.shape == ref.shape
    assert jnp.allclose(out, ref, atol=1e-2, rtol=1e-3)

    # Ragged case (exercises batch/class padding paths): batch=3, feature=256.
    B2, D2, C2 = 3, 256, 2
    x2 = jax.random.normal(kx2, (B2, D2), dtype=jnp.float32)
    embeddings2 = jax.random.normal(ke2, (C2, D2), dtype=jnp.float32)
    out2 = jax.block_until_ready(sim_classifier(x2, embeddings2))
    ref2 = _ref(x2, embeddings2)
    assert out2.shape == ref2.shape
    assert jnp.allclose(out2, ref2, atol=1e-2, rtol=1e-3)

    print("KERNEL_OK")
</pallas_src>

<mosaic_0001>
module attributes {stable_mosaic.version = 11 : i64} {
  func.func @_sim_kernel(%arg0: i32, %arg1: memref<8x128xf32, #tpu.memory_space<vmem>>, %arg2: memref<128x128xf32, #tpu.memory_space<vmem>>, %arg3: memref<8x128xf32, #tpu.memory_space<vmem>>) attributes {dimension_semantics = [#tpu.dimension_semantics<parallel>], iteration_bounds = array<i64: 1>, scalar_prefetch = 0 : i64, scratch_operands = 0 : i64, tpu.core_type = #tpu.core_type<tc>, window_params = [{transform_indices = @transform_0, window_bounds = array<i64: 8, 128>}, {pipeline_mode = #tpu.pipeline_mode<synchronous>, transform_indices = @transform_1, window_bounds = array<i64: 128, 128>}, {transform_indices = @transform_2, window_bounds = array<i64: 8, 128>}]} {
    %c0 = arith.constant 0 : index
    %c0_0 = arith.constant 0 : index
    %0 = vector.load %arg1[%c0, %c0_0] : memref<8x128xf32, #tpu.memory_space<vmem>>, vector<8x128xf32>
    %1 = arith.mulf %0, %0 : vector<8x128xf32>
    %cst = arith.constant dense<0.000000e+00> : vector<8xf32>
    %2 = vector.multi_reduction <add>, %1, %cst [1] : vector<8x128xf32> to vector<8xf32>
    %3 = vector.shape_cast %2 : vector<8xf32> to vector<8x1xf32>
    %cst_1 = arith.constant 1.17549435E-38 : f32
    %4 = vector.broadcast %cst_1 : f32 to vector<8x1xf32>
    %5 = arith.maximumf %3, %4 : vector<8x1xf32>
    %6 = math.rsqrt %5 : vector<8x1xf32>
    %cst_2 = arith.constant 1.000000e+02 : f32
    %7 = vector.broadcast %cst_2 : f32 to vector<8x1xf32>
    %8 = arith.mulf %7, %6 : vector<8x1xf32>
    %9 = vector.broadcast %8 : vector<8x1xf32> to vector<8x128xf32>
    %10 = arith.mulf %0, %9 : vector<8x128xf32>
    %c0_3 = arith.constant 0 : index
    %c0_4 = arith.constant 0 : index
    %11 = vector.load %arg2[%c0_3, %c0_4] : memref<128x128xf32, #tpu.memory_space<vmem>>, vector<128x128xf32>
    %cst_5 = arith.constant dense<0.000000e+00> : vector<8x128xf32>
    %12 = tpu.matmul %10, %11, %cst_5 {dimension_numbers = #tpu.dot_dimension_numbers<[1], [1], [0], [0], [0, 0, 1, 0], [], []>} : vector<8x128xf32>, vector<128x128xf32>, vector<8x128xf32> -> vector<8x128xf32>
    %c0_6 = arith.constant 0 : index
    %c0_7 = arith.constant 0 : index
    %13 = vector.load %arg3[%c0_6, %c0_7] : memref<8x128xf32, #tpu.memory_space<vmem>>, vector<8x128xf32>
    tpu.vector_store %arg3[%c0_6, %c0_7], %12 {strides = array<i32>} : memref<8x128xf32, #tpu.memory_space<vmem>>, vector<8x128xf32>,
    return
  }
  func.func @transform_0(%arg0: i32) -> (i32, i32) {
    %c0_i32 = arith.constant 0 : i32
    %c0_i32_0 = arith.constant 0 : i32
    return %arg0, %c0_i32 : i32, i32
  }
  func.func @transform_1(%arg0: i32) -> (i32, i32) {
    %c0_i32 = arith.constant 0 : i32
    %c0_i32_0 = arith.constant 0 : i32
    %c0_i32_1 = arith.constant 0 : i32
    return %c0_i32, %c0_i32_0 : i32, i32
  }
  func.func @transform_2(%arg0: i32) -> (i32, i32) {
    %c0_i32 = arith.constant 0 : i32
    %c0_i32_0 = arith.constant 0 : i32
    return %arg0, %c0_i32 : i32, i32
  }
}

</mosaic_0001>

<bundles_post_ra>
// kernel: tpu_custom_call.1
= control target key start
LH: loop header
LB: loop body
LE: loop exit
PB: predicated region body
PF: predicated region fallthrough
CT: control target
= control target key end

     0   :  { %7 = vsyncpa [#allocation3], 0  ;;  %s373_s0 = inlined_call_operand.hbm [shape: f32[8,128], index: 0, kind: input, shape index: {}]   ;;  %s374_s1 = inlined_call_operand.hbm [shape: f32[128,128], index: 1, kind: input, shape index: {}]   ;;  %s375_s2 = inlined_call_operand.hbm [shape: f32[8,128], index: 2, kind: output, shape index: {}]  }
   0x1   :  { %8 = vsyncpa [#allocation6], 0 }
   0x2   :  { %9 = vsyncpa [#allocation4], 0  ;;  %s307_s9 = smov [#allocation2]   ;;  %s308_s11 = smov [#allocation5]  }
   0x3   :  { %s16_s10 = sshll.u32 %s307_s9, 4  ;;  %s25_s12 = sshll.u32 %s308_s11, 4  ;;  %s17_s10 = int_to_ptr.vmem [resolvable:$true] %s16_s10  ;;  %s330_s12 = int_to_ptr.vmem [resolvable:$true] %s25_s12 }
   0x4   :  { %s235_s15 = scalar_lea.hbm %s373_s0, 128 }
   0x5   :  { %p236_p0 = scmp.ne.s32.totalorder %s373_s0, %s235_s15  ;;  %p239_p1 = scmp.lt.u32.totalorder %s235_s15, %s373_s0 }
   0x7   :  { %p241_p2 = pnand %p239_p1, %p236_p0 }
   0x9   :  { %244 = shalt.err (!%p241_p2)
}
   0xa   :  { %s245_s20 = scalar_lea.vmem %s17_s10, 128  ;;  %p250_p4 = scmp.lt.s32.totalorder %s17_s10, %s17_s10 }
   0xb   :  { %p246_p3 = scmp.ne.s32.totalorder %s17_s10, %s245_s20  ;;  %p251_p5 = scmp.lt.s32.totalorder %s245_s20, %s245_s20 }
   0xd   :  { %p252_p6 = por %p251_p5, %p250_p4 }
   0xf   :  { %p253_p7 = pnand %p252_p6, %p246_p3 }
  0x11   :  { %256 = shalt.err (!%p253_p7)
}
  0x12   :  { %19 = dma.hbm_to_vmem [thread:$0]  %s373_s0, 128, %s17_s10, [#allocation3]  }
  0x13   :  { %s257_s25 = scalar_lea.hbm %s374_s1, 2048 }
  0x14   :  { %p258_p8 = scmp.ne.s32.totalorder %s374_s1, %s257_s25  ;;  %p261_p9 = scmp.lt.u32.totalorder %s257_s25, %s374_s1 }
  0x16   :  { %p263_p10 = pnand %p261_p9, %p258_p8 }
  0x18   :  { %266 = shalt.err (!%p263_p10)
}
  0x19   :  { %s267_s30 = scalar_lea.vmem %s330_s12, 2048  ;;  %p272_p12 = scmp.lt.s32.totalorder %s330_s12, %s330_s12 }
  0x1a   :  { %p268_p11 = scmp.ne.s32.totalorder %s330_s12, %s267_s30  ;;  %p273_p13 = scmp.lt.s32.totalorder %s267_s30, %s267_s30 }
  0x1c   :  { %p274_p0 = por %p273_p13, %p272_p12 }
  0x1e   :  { %p275_p1 = pnand %p274_p0, %p268_p11 }
  0x20   :  { %278 = shalt.err (!%p275_p1)
}
  0x21   :  { %s309_s0 = smov 128   ;;  %s310_s3 = smov 8  }
  0x22   :  { %31 = dma.hbm_to_vmem [thread:$0]  %s374_s1, 2048, %s330_s12, [#allocation6], %s309_s0, %s309_s0, %s310_s3  }
  0x23   :  { %301 = dma.done.wait [#allocation3], 128  }
  0x24   :  { %302 = vsyncadd [#allocation3], 4294967168 }
  0x25   :  { %303 = dma.done.wait [#allocation6], 2048  }
  0x26   :  { %304 = vsyncadd [#allocation6], 4294965248  ;;  %v311_v0 = vmov 0.0|0.0   ;;  %v38_v1 = vld [vmem:[#allocation2] sm:$0xff]  ;;  %v46_v2 = vld [vmem:[#allocation5] sm:$0xff]  ;;  %vm312_vm0 = vmmov 0  }
  0x27   :  { %201 = vmatprep.subr.bf16.mxu0 %v311_v0  ;;  %v47_v3 = vld [vmem:[#allocation5 + $0x8] sm:$0xff]  ;;  %v39_v4 = vmul.f32 %v38_v1, %v38_v1  ;;  %v48_v6 = vld [vmem:[#allocation5 + $0x10] sm:$0xff]  ;;  %v49_v7 = vld [vmem:[#allocation5 + $0x18] sm:$0xff]  ;;  %v313_v18 = vmov 0.0   ;;  %s314_s1 = smov [#allocation7]  }
  0x28   :  { %v202_v5 = vpack.c.bf16 %v47_v3, %v46_v2  ;;  %v205_v8 = vpack.c.bf16 %v49_v7, %v48_v6  ;;  %v50_v9 = vld [vmem:[#allocation5 + $0x20] sm:$0xff]  ;;  %v51_v10 = vld [vmem:[#allocation5 + $0x28] sm:$0xff]  ;;  %v52_v12 = vld [vmem:[#allocation5 + $0x30] sm:$0xff]  ;;  %198 = vmatprep.mubr.msk.f32.mxu0 %vm312_vm0, %v313_v18  ;;  %s139_s6 = sshll.u32 %s314_s1, 4  ;;  %s140_s6 = int_to_ptr.vmem [resolvable:$true] %s139_s6 }
  0x29   :  { %40 = vadd.xlane.f32.xlu0 %v39_v4  ;;  %v208_v11 = vpack.c.bf16 %v51_v10, %v50_v9  ;;  %v53_v13 = vld [vmem:[#allocation5 + $0x38] sm:$0xff]  ;;  %v54_v15 = vld [vmem:[#allocation5 + $0x40] sm:$0xff]  ;;  %v55_v16 = vld [vmem:[#allocation5 + $0x48] sm:$0xff]  ;;  %s279_s7 = scalar_lea.vmem %s140_s6, 128  ;;  %p284_p3 = scmp.lt.s32.totalorder %s140_s6, %s140_s6 }
  0x2a   :  { %203 = vmatpush3.bf16.xpose.msra.mxu0 %v202_v5  ;;  %v211_v14 = vpack.c.bf16 %v53_v13, %v52_v12  ;;  %v214_v17 = vpack.c.bf16 %v55_v16, %v54_v15  ;;  %v56_v19 = vld [vmem:[#allocation5 + $0x50] sm:$0xff]  ;;  %v57_v20 = vld [vmem:[#allocation5 + $0x58] sm:$0xff]  ;;  %v58_v22 = vld [vmem:[#allocation5 + $0x60] sm:$0xff]  ;;  %p280_p2 = scmp.ne.s32.totalorder %s140_s6, %s279_s7  ;;  %p285_p4 = scmp.lt.s32.totalorder %s279_s7, %s279_s7 }
  0x2b   :  { %204 = vmatprep.subr.bf16.mxu0 %v311_v0  ;;  %v217_v21 = vpack.c.bf16 %v57_v20, %v56_v19  ;;  %v59_v23 = vld [vmem:[#allocation5 + $0x68] sm:$0xff]  ;;  %v60_v25 = vld [vmem:[#allocation5 + $0x70] sm:$0xff]  ;;  %v61_v26 = vld [vmem:[#allocation5 + $0x78] sm:$0xff] }
  0x2c   :  { %v220_v24 = vpack.c.bf16 %v59_v23, %v58_v22  ;;  %v223_v27 = vpack.c.bf16 %v61_v26, %v60_v25  ;;  %p286_p5 = por %p285_p4, %p284_p3 }
  0x2e   :  { %p287_p6 = pnand %p286_p5, %p280_p2 }
  0x32   :  { %206 = vmatpush3.bf16.xpose.msra.mxu0 %v205_v8 }
  0x33   :  { %207 = vmatprep.subr.bf16.mxu0 %v311_v0 }
  0x3a   :  { %209 = vmatpush3.bf16.xpose.msra.mxu0 %v208_v11 }
  0x3b   :  { %210 = vmatprep.subr.bf16.mxu0 %v311_v0 }
  0x42   :  { %212 = vmatpush3.bf16.xpose.msra.mxu0 %v211_v14 }
  0x43   :  { %213 = vmatprep.subr.bf16.mxu0 %v311_v0 }
  0x4a   :  { %215 = vmatpush3.bf16.xpose.msra.mxu0 %v214_v17 }
  0x4b   :  { %216 = vmatprep.subr.bf16.mxu0 %v311_v0 }
  0x52   :  { %218 = vmatpush3.bf16.xpose.msra.mxu0 %v217_v21 }
  0x53   :  { %219 = vmatprep.subr.bf16.mxu0 %v311_v0 }
  0x5a   :  { %221 = vmatpush3.bf16.xpose.msra.mxu0 %v220_v24 }
  0x5b   :  { %222 = vmatprep.subr.bf16.mxu0 %v311_v0 }
  0x62   :  { %224 = vmatpush3.bf16.xpose.msra.mxu0 %v223_v27 }
  0xb6   :  { %v41_v28 = vpop.xlane.xlu0 %40 }
  0xb7   :  { %v42_v29 = vmax.f32 %v41_v28, 1.1754944e-38 }
  0xb9   :  { %233 = vrsqrt.f32 %v42_v29 }
  0xc3   :  { %v234_v30 = vpop.eup %233 }
  0xc4   :  { %v44_v31 = vmul.f32 100.0, %v234_v30 }
  0xc6   :  { %v45_v32 = vmul.f32 %v44_v31, %v38_v1 }
  0xc8   :  { %199 = vmatmul.mubr.f32.vlgmr.msra.gmra.mrb[0].mxu0 %v45_v32 }
 0x19b   :  { %v128_v33 = vpop.f32.mrb[0].mxu0 }
 0x19c   :  { %132 = vst [vmem:[#allocation7] sm:$0xff] %v128_v33  ;;  %v200_v34 = vpop.f32.mrb[1].mxu0 }
 0x19d   :  { %290 = shalt.err (!%p287_p6)
}
 0x19e   :  { %s291_s10 = scalar_lea.hbm %s375_s2, 128 }
 0x19f   :  { %p292_p7 = scmp.ne.s32.totalorder %s375_s2, %s291_s10  ;;  %p295_p8 = scmp.lt.u32.totalorder %s291_s10, %s375_s2 }
 0x1a1   :  { %p297_p9 = pnand %p295_p8, %p292_p7 }
 0x1a3   :  { %300 = shalt.err (!%p297_p9)
}
 0x1a4   :  { %142 = dma.vmem_to_hbm [thread:$0]  %s140_s6, 128, %s375_s2, [#allocation4]  }
 0x1a5   :  { %305 = dma.done.wait [#allocation4], 128  }
 0x1a6   :  { %306 = vsyncadd [#allocation4], 4294967168 }
 0x1a7   :  { %146 = vsyncpa [#allocation3], 1 }
 0x1a8   :  { %147 = vsyncpa [#allocation6], 1 }
 0x1a9   :  { %148 = vsyncpa [#allocation4], 1 }

</bundles_post_ra>
